<compile_context>
chip_gen: v6e
topology: v6e:2x2x1
jax: 0.10.0
libtpu: 0.0.40
codegen_flags: <defaults>
</compile_context>

<pallas_src>
import jax
import jax.numpy as jnp
from jax.experimental import pallas as pl
from jax.experimental.pallas import tpu as pltpu


def _round_up(x: int, m: int) -> int:
    return (x + m - 1) // m * m


def _gather_tile_kernel(ids_ref, table_ref, out_ref):
    """One grid step: gather TILE_T rows from the VMEM-resident table.

    ids_ref   : (TILE_T, 1)       int32   token ids (tokens on sublanes)
    table_ref : (vocab, dim_pad)  float32 whole embedding table (resident)
    out_ref   : (TILE_T, dim_pad) float32 dense output tile
    """
    ids = ids_ref[...]                                   # (T, 1) int32
    tile_t = ids.shape[0]
    vocab = table_ref.shape[0]

    # One-hot selection matrix (T, vocab): row t has a 1 at column ids[t].
    col = jax.lax.broadcasted_iota(jnp.int32, (tile_t, vocab), 1)
    one_hot = (col == ids).astype(table_ref.dtype)       # broadcast (T,1)->(T,V)

    # Row gather expressed as a dense MXU matmul against the resident table.
    out_ref[...] = jnp.dot(
        one_hot, table_ref[...], preferred_element_type=jnp.float32
    ).astype(out_ref.dtype)


# Resident-table cutoff sized against v7x's 64 MiB physical VMEM (table is
# double-buffered by the pipeline plus output tiles + one-hot temporaries).
_MAX_RESIDENT_TABLE_BYTES = 20 * 2**20


def doc_embedding_forward(embedding_matrix: jax.Array,
                          input_ids: jax.Array,
                          *,
                          tile_tokens: int = 512) -> jax.Array:
    """Pallas equivalent of `embedding_matrix[input_ids]`."""
    vocab, dim = embedding_matrix.shape
    batch, seq = input_ids.shape
    n_tok = batch * seq

    # Lane-align the embedding dim (200 -> 256): pad columns with zeros and
    # slice them back off after the kernel so DMAs/stores stay full-tile.
    dim_p = _round_up(dim, 128)
    table = embedding_matrix
    if dim_p != dim:
        table = jnp.pad(embedding_matrix, ((0, 0), (0, dim_p - dim)))

    table_bytes = vocab * dim_p * table.dtype.itemsize
    if table_bytes > _MAX_RESIDENT_TABLE_BYTES:
        # TODO(synk): large-vocab tier — keep the table in pl.ANY (HBM) and do a
        # manually double-buffered per-row DMA gather instead of this path.
        raise NotImplementedError(
            "embedding table too large for the VMEM-resident gather path")

    # Token tile: multiple of 8 sublanes; whole problem in one tile when small.
    tile_t = min(int(tile_tokens), _round_up(n_tok, 8))
    tile_t = _round_up(tile_t, 8)
    n_tok_p = _round_up(n_tok, tile_t)
    n_tiles = n_tok_p // tile_t

    # Flatten, clamp, pad to a whole number of tiles, tokens on the sublane axis.
    flat_ids = jnp.clip(input_ids.reshape(n_tok).astype(jnp.int32), 0, vocab - 1)
    ids2d = jnp.pad(flat_ids, (0, n_tok_p - n_tok)).reshape(n_tok_p, 1)

    out_tile_bytes = tile_t * dim_p * table.dtype.itemsize
    onehot_bytes = tile_t * _round_up(vocab, 128) * 4
    vmem_limit = int(
        min(56 * 2**20,
            max(32 * 2**20,
                2 * table_bytes + 4 * out_tile_bytes + 2 * onehot_bytes
                + (2 << 20))))

    flat_out = pl.pallas_call(
        _gather_tile_kernel,
        out_shape=jax.ShapeDtypeStruct((n_tok_p, dim_p), embedding_matrix.dtype),
        grid=(n_tiles,),
        in_specs=[
            # (TILE_T, 1) id tile, tokens on sublanes.
            pl.BlockSpec((tile_t, 1), lambda t: (t, 0)),
            # Whole table, constant block index -> stays VMEM-resident.
            pl.BlockSpec((vocab, dim_p), lambda t: (0, 0)),
        ],
        out_specs=pl.BlockSpec((tile_t, dim_p), lambda t: (t, 0)),
        compiler_params=pltpu.CompilerParams(
            dimension_semantics=("parallel",),
            vmem_limit_bytes=vmem_limit,
        ),
    )(ids2d, table)

    return flat_out[:n_tok, :dim].reshape(batch, seq, dim)


if __name__ == "__main__":
    # Small shapes consistent with the module (embedding_dim keeps the module
    # default of 200; the wrapper pads it to 256 internally).
    vocab_size = 64
    embedding_dim = 200
    batch, seq = 2, 8

    key = jax.random.PRNGKey(0)
    k_emb, k_ids = jax.random.split(key)

    # Deterministic "torch.randn(vocab_size, embedding_dim)" parameter.
    embedding_matrix = jax.random.normal(
        k_emb, (vocab_size, embedding_dim), dtype=jnp.float32)
    input_ids = jax.random.randint(
        k_ids, (batch, seq), 0, vocab_size, dtype=jnp.int32)

    out = doc_embedding_forward(embedding_matrix, input_ids)
    out = jax.block_until_ready(out)

    # Reference check against plain JAX indexing (same semantics as PyTorch).
    ref = embedding_matrix[input_ids]
    assert out.shape == (batch, seq, embedding_dim)
    assert out.dtype == jnp.float32
    assert jnp.allclose(out, ref), "Pallas gather mismatch vs reference"

    print("KERNEL_OK")
</pallas_src>

<mosaic_0001>
module attributes {stable_mosaic.version = 11 : i64} {
  func.func @_gather_tile_kernel(%arg0: i32, %arg1: memref<16x1xi32, #tpu.memory_space<vmem>>, %arg2: memref<64x256xf32, #tpu.memory_space<vmem>>, %arg3: memref<16x256xf32, #tpu.memory_space<vmem>>) attributes {dimension_semantics = [#tpu.dimension_semantics<parallel>], iteration_bounds = array<i64: 1>, scalar_prefetch = 0 : i64, scratch_operands = 0 : i64, tpu.core_type = #tpu.core_type<tc>, window_params = [{transform_indices = @transform_0, window_bounds = array<i64: 16, 1>}, {pipeline_mode = #tpu.pipeline_mode<synchronous>, transform_indices = @transform_1, window_bounds = array<i64: 64, 256>}, {transform_indices = @transform_2, window_bounds = array<i64: 16, 256>}]} {
    %c0 = arith.constant 0 : index
    %c0_0 = arith.constant 0 : index
    %0 = vector.load %arg1[%c0, %c0_0] : memref<16x1xi32, #tpu.memory_space<vmem>>, vector<16x1xi32>
    %1 = tpu.iota {dimensions = array<i32: 1>} : vector<16x64xi32>
    %2 = vector.broadcast %0 : vector<16x1xi32> to vector<16x64xi32>
    %3 = arith.cmpi eq, %1, %2 : vector<16x64xi32>
    %4 = arith.extui %3 : vector<16x64xi1> to vector<16x64xi32>
    %5 = arith.sitofp %4 : vector<16x64xi32> to vector<16x64xf32>
    %c0_1 = arith.constant 0 : index
    %c0_2 = arith.constant 0 : index
    %6 = vector.load %arg2[%c0_1, %c0_2] : memref<64x256xf32, #tpu.memory_space<vmem>>, vector<64x256xf32>
    %cst = arith.constant dense<0.000000e+00> : vector<16x256xf32>
    %7 = tpu.matmul %5, %6, %cst {dimension_numbers = #tpu.dot_dimension_numbers<[1], [0], [0], [1], [0, 0, 1, 1], [], []>} : vector<16x64xf32>, vector<64x256xf32>, vector<16x256xf32> -> vector<16x256xf32>
    %c0_3 = arith.constant 0 : index
    %c0_4 = arith.constant 0 : index
    %8 = vector.load %arg3[%c0_3, %c0_4] : memref<16x256xf32, #tpu.memory_space<vmem>>, vector<16x256xf32>
    tpu.vector_store %arg3[%c0_3, %c0_4], %7 {strides = array<i32>} : memref<16x256xf32, #tpu.memory_space<vmem>>, vector<16x256xf32>,
    return
  }
  func.func @transform_0(%arg0: i32) -> (i32, i32) {
    %c0_i32 = arith.constant 0 : i32
    %c0_i32_0 = arith.constant 0 : i32
    return %arg0, %c0_i32 : i32, i32
  }
  func.func @transform_1(%arg0: i32) -> (i32, i32) {
    %c0_i32 = arith.constant 0 : i32
    %c0_i32_0 = arith.constant 0 : i32
    %c0_i32_1 = arith.constant 0 : i32
    return %c0_i32, %c0_i32_0 : i32, i32
  }
  func.func @transform_2(%arg0: i32) -> (i32, i32) {
    %c0_i32 = arith.constant 0 : i32
    %c0_i32_0 = arith.constant 0 : i32
    return %arg0, %c0_i32 : i32, i32
  }
}

</mosaic_0001>

<bundles_post_ra>
// kernel: tpu_custom_call.1
= control target key start
LH: loop header
LB: loop body
LE: loop exit
PB: predicated region body
PF: predicated region fallthrough
CT: control target
= control target key end

     0   :  { %7 = vsyncpa [#allocation3], 0  ;;  %s277_s0 = inlined_call_operand.vmem [shape: s32[16,1], index: 0, kind: input, shape index: {}]   ;;  %s278_s1 = inlined_call_operand.hbm [shape: f32[64,256], index: 1, kind: input, shape index: {}]   ;;  %s279_s2 = inlined_call_operand.hbm [shape: f32[16,256], index: 2, kind: output, shape index: {}]  }
   0x1   :  { %8 = vsyncpa [#allocation4], 0  ;;  %s234_s9 = smov [#allocation2]  }
   0x2   :  { %s16_s10 = sshll.u32 %s234_s9, 4  ;;  %s17_s10 = int_to_ptr.vmem [resolvable:$true] %s16_s10 }
   0x3   :  { %s198_s11 = scalar_lea.vmem %s17_s10, 2048  ;;  %p203_p1 = scmp.lt.s32.totalorder %s17_s10, %s17_s10 }
   0x4   :  { %p199_p0 = scmp.ne.s32.totalorder %s17_s10, %s198_s11  ;;  %p204_p2 = scmp.lt.s32.totalorder %s198_s11, %s198_s11 }
   0x6   :  { %p205_p3 = por %p204_p2, %p203_p1 }
   0x8   :  { %p206_p4 = pnand %p205_p3, %p199_p0 }
   0xa   :  { %209 = shalt.err (!%p206_p4)
}
   0xb   :  { %s235_s12 = smov 256   ;;  %s236_s13 = smov 16  }
   0xc   :  { %22 = dma.hbm_to_vmem [thread:$0]  %s278_s1, 2048, %s17_s10, [#allocation3], %s235_s12, %s235_s12, %s236_s13  }
   0xd   :  { %230 = dma.done.wait [#allocation3], 2048  }
   0xe   :  { %231 = vsyncadd [#allocation3], 4294965248  ;;  %v237_v0 = vmov 0   ;;  %v238_v1 = vmov 0.0   ;;  %v26_v2 = vld [vmem:[%s277_s0] sm:$0xff]  ;;  %v57_v3 = vld [vmem:[#allocation2 + $0x78] sm:$0xff]  ;;  %v28_v20 = vlaneseq }
   0xf   :  { %189 = vset.pattern.permute.xlu0 %v237_v0  ;;  %129 = vmatprep.mubr.f32.mxu0 %v238_v1  ;;  %v56_v4 = vld [vmem:[#allocation2 + $0x70] sm:$0xff]  ;;  %v55_v5 = vld [vmem:[#allocation2 + $0x68] sm:$0xff]  ;;  %v54_v6 = vld [vmem:[#allocation2 + $0x60] sm:$0xff]  ;;  %vm58_vm0 = vcmask 523264  }
  0x10   :  { %135 = vmatprep.mubr.f32.mxu1 %v238_v1  ;;  %31 = vperm.xlu0 %189, %v26_v2   ;;  %v27_v7 = vld [vmem:[%s277_s0 + $0x8] sm:$0xff]  ;;  %v53_v8 = vld [vmem:[#allocation2 + $0x58] sm:$0xff]  ;;  %v52_v9 = vld [vmem:[#allocation2 + $0x50] sm:$0xff]  ;;  %v29_v21 = vand.u32 127, %v28_v20  ;;  %s239_s0 = smov [#allocation5]  }
  0x11   :  { %81 = vmatprep.subr.mxu0 %v57_v3  ;;  %167 = vmatprep.subr.mxu1 %v57_v3  ;;  %v51_v10 = vld [vmem:[#allocation2 + $0x48] sm:$0xff]  ;;  %v50_v11 = vld [vmem:[#allocation2 + $0x40] sm:$0xff]  ;;  %v49_v12 = vld [vmem:[#allocation2 + $0x38] sm:$0xff]  ;;  %s151_s19 = sshll.u32 %s239_s0, 4  ;;  %s152_s19 = int_to_ptr.vmem [resolvable:$true] %s151_s19 }
  0x12   :  { %82 = vmatpush1.msra.mxu0 %v56_v4  ;;  %175 = vmatpush1.msra.mxu1 %v56_v4  ;;  %v48_v13 = vld [vmem:[#allocation2 + $0x30] sm:$0xff]  ;;  %v47_v14 = vld [vmem:[#allocation2 + $0x28] sm:$0xff]  ;;  %v46_v15 = vld [vmem:[#allocation2 + $0x20] sm:$0xff]  ;;  %s210_s20 = scalar_lea.vmem %s152_s19, 512  ;;  %p215_p6 = scmp.lt.s32.totalorder %s152_s19, %s152_s19 }
  0x13   :  { %83 = vmatprep.subr.mxu0 %v55_v5  ;;  %168 = vmatprep.subr.mxu1 %v55_v5  ;;  %v45_v16 = vld [vmem:[#allocation2 + $0x18] sm:$0xff]  ;;  %v44_v17 = vld [vmem:[#allocation2 + $0x10] sm:$0xff]  ;;  %v43_v18 = vld [vmem:[#allocation2 + $0x8] sm:$0xff]  ;;  %p211_p5 = scmp.ne.s32.totalorder %s152_s19, %s210_s20  ;;  %p216_p7 = scmp.lt.s32.totalorder %s210_s20, %s210_s20 }
  0x14   :  { %84 = vmatpush1.msra.mxu0 %v54_v6  ;;  %34 = vperm.xlu0 %189, %v27_v7   ;;  %v42_v19 = vld [vmem:[#allocation2] sm:$0xff] }
  0x15   :  { %85 = vmatprep.subr.mxu0 %v53_v8  ;;  %176 = vmatpush1.msra.mxu1 %v54_v6  ;;  %p217_p8 = por %p216_p7, %p215_p6 }
  0x16   :  { %86 = vmatpush1.msra.mxu0 %v52_v9  ;;  %169 = vmatprep.subr.mxu1 %v53_v8 }
  0x17   :  { %87 = vmatprep.subr.mxu0 %v51_v10  ;;  %177 = vmatpush1.msra.mxu1 %v52_v9  ;;  %p218_p9 = pnand %p217_p8, %p211_p5 }
  0x18   :  { %88 = vmatpush1.msra.mxu0 %v50_v11  ;;  %170 = vmatprep.subr.mxu1 %v51_v10 }
  0x19   :  { %89 = vmatprep.subr.mxu0 %v49_v12  ;;  %178 = vmatpush1.msra.mxu1 %v50_v11 }
  0x1a   :  { %90 = vmatpush1.msra.mxu0 %v48_v13  ;;  %171 = vmatprep.subr.mxu1 %v49_v12 }
  0x1b   :  { %91 = vmatprep.subr.mxu0 %v47_v14  ;;  %179 = vmatpush1.msra.mxu1 %v48_v13 }
  0x1c   :  { %92 = vmatpush1.msra.mxu0 %v46_v15  ;;  %172 = vmatprep.subr.mxu1 %v47_v14 }
  0x1d   :  { %93 = vmatprep.subr.mxu0 %v45_v16  ;;  %180 = vmatpush1.msra.mxu1 %v46_v15 }
  0x1e   :  { %94 = vmatpush1.msra.mxu0 %v44_v17  ;;  %173 = vmatprep.subr.mxu1 %v45_v16 }
  0x1f   :  { %95 = vmatprep.subr.mxu0 %v43_v18  ;;  %181 = vmatpush1.msra.mxu1 %v44_v17 }
  0x20   :  { %96 = vmatpush1.msra.mxu0 %v42_v19  ;;  %174 = vmatprep.subr.mxu1 %v43_v18 }
  0x21   :  { %182 = vmatpush1.msra.mxu1 %v42_v19 }
  0x8b   :  { %v32_v22 = vpop.permute.xlu0 %31 }
  0x8c   :  { %vm36_vm1 = vcmp.eq.s32.totalorder %v29_v21, %v32_v22 }
  0x8d   :  { %v163_v23 = vsel %vm36_vm1, 1.0, %v238_v1 }
  0x8e   :  { %165 = vmatmul.mubr.msk.f32.vlgmr.msra.gmra.mxu0 %vm58_vm0, %v163_v23 }
  0x8f   :  { %v35_v24 = vpop.permute.xlu0 %34 }
  0x90   :  { %vm37_vm2 = vcmp.eq.s32.totalorder %v29_v21, %v35_v24 }
  0x91   :  { %v164_v25 = vsel %vm37_vm2, 1.0, %v238_v1 }
  0x92   :  { %166 = vmatmul.mubr.msk.f32.vlgmr.msra.gmra.mxu1 %vm58_vm0, %v164_v25 }
 0x14e   :  { %v131_v26 = vpop.f32.mrf.mxu0 }
 0x14f   :  { %142 = vst [vmem:[#allocation5] sm:$0xff] %v131_v26 }
 0x150   :  { %v133_v27 = vpop.f32.mrf.mxu0 }
 0x151   :  { %143 = vst [vmem:[#allocation5 + $0x8] sm:$0xff] %v133_v27 }
 0x152   :  { %v137_v28 = vpop.f32.mrf.mxu1 }
 0x153   :  { %144 = vst [vmem:[#allocation5 + $0x10] sm:$0xff] %v137_v28 }
 0x154   :  { %v139_v29 = vpop.f32.mrf.mxu1 }
 0x155   :  { %145 = vst [vmem:[#allocation5 + $0x18] sm:$0xff] %v139_v29 }
 0x156   :  { %221 = shalt.err (!%p218_p9)
}
 0x157   :  { %157 = dma.vmem_to_hbm [thread:$0]  %s152_s19, 512, %s279_s2, [#allocation4], %s235_s12, %s235_s12, %s236_s13  }
 0x158   :  { %232 = dma.done.wait [#allocation4], 512  }
 0x159   :  { %233 = vsyncadd [#allocation4], 4294966784 }
 0x15a   :  { %161 = vsyncpa [#allocation3], 1 }
 0x15b   :  { %162 = vsyncpa [#allocation4], 1 }

</bundles_post_ra>
